<compile_context>
chip_gen: v7x
topology: tpu7x:2x2x1
jax: 0.10.0
libtpu: 0.0.40
codegen_flags: <defaults>
</compile_context>

<pallas_src>
import functools
import math

import jax
import jax.numpy as jnp
from jax.experimental import pallas as pl
from jax.experimental.pallas import tpu as pltpu


CFG = dict(
    d_model=128,
    n_heads=4,
    n_kv_heads=2,
    head_dim=32,            # d_model // n_heads
    rope_theta=500000.0,
    max_batch_size=4,
    max_seq_length=16,
)


# ------------------- Kernel A: fused QKV + RoPE + cache insert ------------- #

def _qkv_rope_kernel(x_ref, wqkv_ref, cos_ref, sin_ref, _ck_hbm, _cv_hbm,
                     q_ref, ck_ref, cv_ref, *, qd, kd):
    # x: (1, S, D); wqkv: (D, qd + 2*kd) bf16; cos/sin: (S, qd + 2*kd) with
    # cos=1 / sin=0 on the V lanes so one fused multiply-add covers q|k|v.
    x = x_ref[0].astype(jnp.bfloat16)                               # (S, D)
    qkv = jnp.dot(x, wqkv_ref[...],
                  preferred_element_type=jnp.float32)               # (S, qd+2kd) f32

    # Interleaved-pair RoPE: out[2i]   = x[2i]*cos   - x[2i+1]*sin
    #                        out[2i+1] = x[2i+1]*cos + x[2i]*sin
    L = qkv.shape[-1]
    lane = jax.lax.broadcasted_iota(jnp.int32, qkv.shape, 1)
    is_even = jnp.bitwise_and(lane, 1) == 0
    nxt = pltpu.roll(qkv, shift=L - 1, axis=1)                      # nxt[i] = qkv[i+1]
    prv = pltpu.roll(qkv, shift=1, axis=1)                          # prv[i] = qkv[i-1]
    rot = jnp.where(is_even, -nxt, prv)
    qkv = qkv * cos_ref[...] + rot * sin_ref[...]                   # V lanes untouched

    q_ref[0] = qkv[:, :qd].astype(jnp.bfloat16)                     # (S, qd)
    ck_ref[0] = qkv[:, qd:qd + kd]                                  # rotated K -> cache
    cv_ref[0] = qkv[:, qd + kd:]                                    # V -> cache


# ------------- Kernel B: all-heads attention + output projection ----------- #

def _attn_out_kernel(q_ref, k_ref, v_ref, mask_ref, wo_ref, o_ref,
                     *, n_heads, n_kv_heads, head_dim):
    rep = n_heads // n_kv_heads
    q = q_ref[0]                                   # (S, H*Dh) bf16 (scale in wq)
    k = k_ref[0].astype(jnp.bfloat16)              # (T, KVH*Dh)
    v = v_ref[0].astype(jnp.bfloat16)
    mask = mask_ref[...]                           # (S, T) additive f32
    wo = wo_ref[...]                               # (H*Dh, D) bf16

    acc = jnp.zeros((q.shape[0], o_ref.shape[-1]), jnp.float32)
    for h in range(n_heads):                       # static unroll, H is small
        g = h // rep                               # GQA: shared KV head
        qh = q[:, h * head_dim:(h + 1) * head_dim]
        kg = k[:, g * head_dim:(g + 1) * head_dim]
        vg = v[:, g * head_dim:(g + 1) * head_dim]
        s = jax.lax.dot_general(qh, kg, (((1,), (1,)), ((), ())),
                                preferred_element_type=jnp.float32)  # (S, T)
        s = s + mask
        s = s - jnp.max(s, axis=-1, keepdims=True)
        p = jnp.exp(s)
        p = p * pl.reciprocal(jnp.sum(p, axis=-1, keepdims=True), approx=True)
        oh = jnp.dot(p.astype(jnp.bfloat16), vg,
                     preferred_element_type=jnp.float32)             # (S, Dh)
        # Fold the head-concat + wo projection into an accumulation.
        acc = acc + jnp.dot(oh.astype(jnp.bfloat16),
                            wo[h * head_dim:(h + 1) * head_dim, :],
                            preferred_element_type=jnp.float32)
    o_ref[0] = acc                                 # lane-dense (S, D) store


# ------------------------------- wrapper ----------------------------------- #

def gqa_forward(params, x, start_pos, mask, cache_k, cache_v, cfg):
    """Functional equivalent of Grouped_Query_Attention.forward.

    x: (B, S, D) f32; mask: (S, T) additive f32 with T = start_pos + S;
    cache_k / cache_v: (max_batch, max_seq, KVH*Dh) f32 functional state.
    Returns (out (B, S, D), new_cache_k, new_cache_v).
    """
    B, S, D = x.shape
    H, KVH, Dh = cfg["n_heads"], cfg["n_kv_heads"], cfg["head_dim"]
    qd, kd = H * Dh, KVH * Dh
    maxB, maxT = cache_k.shape[0], cache_k.shape[1]
    T = start_pos + S
    assert B <= maxB and T <= maxT
    assert start_pos % S == 0 and maxT % S == 0 and S % 8 == 0
    assert mask.shape == (S, T)
    # TODO(synk): decode path (S == 1, arbitrary start_pos) needs an element-indexed
    # or manual-DMA cache write; only the prefill-style blocking is exercised here.

    cos = params["rope_cos"][start_pos:start_pos + S]    # (S, qd + 2*kd)
    sin = params["rope_sin"][start_pos:start_pos + S]
    tb = start_pos // S                                  # cache block index along T

    q, new_ck, new_cv = pl.pallas_call(
        functools.partial(_qkv_rope_kernel, qd=qd, kd=kd),
        grid=(B,),
        in_specs=[
            pl.BlockSpec((1, S, D), lambda b: (b, 0, 0)),
            pl.BlockSpec((D, qd + 2 * kd), lambda b: (0, 0)),
            pl.BlockSpec((S, qd + 2 * kd), lambda b: (0, 0)),
            pl.BlockSpec((S, qd + 2 * kd), lambda b: (0, 0)),
            pl.BlockSpec(memory_space=pl.ANY),   # aliased cache_k (no DMA, unused)
            pl.BlockSpec(memory_space=pl.ANY),   # aliased cache_v (no DMA, unused)
        ],
        out_specs=[
            pl.BlockSpec((1, S, qd), lambda b: (b, 0, 0)),
            pl.BlockSpec((1, S, kd), lambda b: (b, tb, 0)),
            pl.BlockSpec((1, S, kd), lambda b: (b, tb, 0)),
        ],
        out_shape=[
            jax.ShapeDtypeStruct((B, S, qd), jnp.bfloat16),
            jax.ShapeDtypeStruct((maxB, maxT, kd), jnp.float32),
            jax.ShapeDtypeStruct((maxB, maxT, kd), jnp.float32),
        ],
        input_output_aliases={4: 1, 5: 2},       # in-place KV-cache insert
        compiler_params=pltpu.CompilerParams(dimension_semantics=("parallel",)),
    )(x, params["wqkv_t"], cos, sin, cache_k, cache_v)

    out = pl.pallas_call(
        functools.partial(_attn_out_kernel, n_heads=H, n_kv_heads=KVH, head_dim=Dh),
        grid=(B,),
        in_specs=[
            pl.BlockSpec((1, S, qd), lambda b: (b, 0, 0)),
            pl.BlockSpec((1, T, kd), lambda b: (b, 0, 0)),   # K cache, once per batch
            pl.BlockSpec((1, T, kd), lambda b: (b, 0, 0)),   # V cache, once per batch
            pl.BlockSpec((S, T), lambda b: (0, 0)),
            pl.BlockSpec((qd, D), lambda b: (0, 0)),
        ],
        out_specs=pl.BlockSpec((1, S, D), lambda b: (b, 0, 0)),
        out_shape=jax.ShapeDtypeStruct((B, S, D), jnp.float32),
        compiler_params=pltpu.CompilerParams(dimension_semantics=("parallel",)),
    )(q, new_ck, new_cv, mask, params["wo_t"])

    return out, new_ck, new_cv


# ------------------------------- params ------------------------------------ #

def init_params(cfg, key):
    D, H, KVH, Dh = cfg["d_model"], cfg["n_heads"], cfg["n_kv_heads"], cfg["head_dim"]
    qd, kd = H * Dh, KVH * Dh
    k1, k2, k3, k4 = jax.random.split(key, 4)

    def nrm(k, shape, scale=0.02):
        return jax.random.normal(k, shape, jnp.float32) * scale

    # nn.Linear weights are (out, in); store the transposed (in, out) form.
    wq_t = nrm(k1, (qd, D)).T * (1.0 / math.sqrt(Dh))   # SDPA scale folded into wq
    wk_t = nrm(k2, (kd, D)).T
    wv_t = nrm(k3, (kd, D)).T
    wqkv_t = jnp.concatenate([wq_t, wk_t, wv_t], axis=1).astype(jnp.bfloat16)
    wo_t = nrm(k4, (D, qd)).T.astype(jnp.bfloat16)      # (qd, D)

    # RoPE tables, pair-interleaved and tiled so they apply directly to the
    # fused q|k|v lanes (cos=1 / sin=0 on the V lanes -> V passes through).
    max_pos = cfg["max_seq_length"] * 2
    freqs = 1.0 / (cfg["rope_theta"] ** (jnp.arange(0, Dh, 2, dtype=jnp.float32) / Dh))
    ang = jnp.outer(jnp.arange(max_pos, dtype=jnp.float32), freqs)   # (max_pos, Dh//2)
    cos_pair = jnp.repeat(jnp.cos(ang), 2, axis=-1)                  # (max_pos, Dh)
    sin_pair = jnp.repeat(jnp.sin(ang), 2, axis=-1)
    n_qk_heads = H + KVH
    rope_cos = jnp.concatenate(
        [jnp.tile(cos_pair, (1, n_qk_heads)), jnp.ones((max_pos, kd), jnp.float32)], axis=1)
    rope_sin = jnp.concatenate(
        [jnp.tile(sin_pair, (1, n_qk_heads)), jnp.zeros((max_pos, kd), jnp.float32)], axis=1)

    return dict(wqkv_t=wqkv_t, wo_t=wo_t, rope_cos=rope_cos, rope_sin=rope_sin)


# ----------------------- pure-JAX reference (f32) --------------------------- #

def gqa_reference(params, x, start_pos, mask, cache_k, cache_v, cfg):
    D, H, KVH, Dh = cfg["d_model"], cfg["n_heads"], cfg["n_kv_heads"], cfg["head_dim"]
    qd, kd = H * Dh, KVH * Dh
    B, S, _ = x.shape
    rep = H // KVH
    wqkv = params["wqkv_t"].astype(jnp.float32)
    wo = params["wo_t"].astype(jnp.float32)
    wq, wk, wv = wqkv[:, :qd], wqkv[:, qd:qd + kd], wqkv[:, qd + kd:]
    q = (x @ wq).reshape(B, S, H, Dh)          # SDPA scale already folded into wq
    k = (x @ wk).reshape(B, S, KVH, Dh)
    v = (x @ wv).reshape(B, S, KVH, Dh)

    freqs = 1.0 / (cfg["rope_theta"] ** (jnp.arange(0, Dh, 2, dtype=jnp.float32) / Dh))
    ang = jnp.outer(jnp.arange(start_pos, start_pos + S, dtype=jnp.float32), freqs)
    cos = jnp.cos(ang)[None, :, None, :]
    sin = jnp.sin(ang)[None, :, None, :]

    def rope(t):
        te, to = t[..., 0::2], t[..., 1::2]
        re = te * cos - to * sin
        ro = to * cos + te * sin
        return jnp.stack([re, ro], axis=-1).reshape(t.shape)

    q, k = rope(q), rope(k)
    ck = cache_k.at[:B, start_pos:start_pos + S].set(k.reshape(B, S, kd))
    cv = cache_v.at[:B, start_pos:start_pos + S].set(v.reshape(B, S, kd))
    T = start_pos + S
    keys = jnp.repeat(ck[:B, :T].reshape(B, T, KVH, Dh), rep, axis=2)
    vals = jnp.repeat(cv[:B, :T].reshape(B, T, KVH, Dh), rep, axis=2)
    s = jnp.einsum('bshd,bthd->bhst', q, keys) + mask[None, None]
    p = jax.nn.softmax(s, axis=-1)
    o = jnp.einsum('bhst,bthd->bshd', p, vals).reshape(B, S, qd)
    return o @ wo, ck, cv


# -------------------------------- main -------------------------------------- #

if __name__ == "__main__":
    cfg = CFG
    key = jax.random.PRNGKey(0)
    pkey, xkey = jax.random.split(key)
    params = init_params(cfg, pkey)

    B, S = 2, 8
    D = cfg["d_model"]
    KVH, Dh = cfg["n_kv_heads"], cfg["head_dim"]
    start_pos = 0
    T = start_pos + S

    x = jax.random.normal(xkey, (B, S, D), jnp.float32)
    mask = jnp.triu(jnp.full((S, T), float("-inf"), jnp.float32), k=1 + start_pos)
    cache_k = jnp.zeros((cfg["max_batch_size"], cfg["max_seq_length"], KVH * Dh),
                        jnp.float32)
    cache_v = jnp.zeros_like(cache_k)

    out, new_ck, new_cv = gqa_forward(params, x, start_pos, mask,
                                      cache_k, cache_v, cfg)
    out = jax.block_until_ready(out)

    assert out.shape == (B, S, D)
    assert out.dtype == jnp.float32
    assert bool(jnp.isfinite(out).all())
    assert bool(jnp.isfinite(new_ck).all()) and bool(jnp.isfinite(new_cv).all())

    # Correctness vs a pure-JAX f32 reference (loose tolerance for bf16 MXU inputs).
    ref_out, ref_ck, ref_cv = gqa_reference(params, x, start_pos, mask,
                                            cache_k, cache_v, cfg)
    assert bool(jnp.allclose(out, ref_out, atol=5e-3, rtol=5e-2))
    assert bool(jnp.allclose(new_ck, ref_ck, atol=1e-2, rtol=5e-2))
    assert bool(jnp.allclose(new_cv, ref_cv, atol=1e-2, rtol=5e-2))

    print("KERNEL_OK")
</pallas_src>

<mosaic_0001>
module attributes {stable_mosaic.version = 11 : i64} {
  func.func @_qkv_rope_kernel(%arg0: i32, %arg1: memref<1x8x128xf32, #tpu.memory_space<vmem>>, %arg2: memref<128x256xbf16, #tpu.memory_space<vmem>>, %arg3: memref<8x256xf32, #tpu.memory_space<vmem>>, %arg4: memref<8x256xf32, #tpu.memory_space<vmem>>, %arg5: memref<4x16x64xf32, #tpu.memory_space<any>>, %arg6: memref<4x16x64xf32, #tpu.memory_space<any>>, %arg7: memref<1x8x128xbf16, #tpu.memory_space<vmem>>, %arg8: memref<1x8x64xf32, #tpu.memory_space<vmem>>, %arg9: memref<1x8x64xf32, #tpu.memory_space<vmem>>) attributes {dimension_semantics = [#tpu.dimension_semantics<parallel>], iteration_bounds = array<i64: 2>, scalar_prefetch = 0 : i64, scratch_operands = 0 : i64, tpu.core_type = #tpu.core_type<tc>, window_params = [{transform_indices = @transform_0, window_bounds = array<i64: 1, 8, 128>}, {pipeline_mode = #tpu.pipeline_mode<synchronous>, transform_indices = @transform_1, window_bounds = array<i64: 128, 256>}, {pipeline_mode = #tpu.pipeline_mode<synchronous>, transform_indices = @transform_2, window_bounds = array<i64: 8, 256>}, {pipeline_mode = #tpu.pipeline_mode<synchronous>, transform_indices = @transform_3, window_bounds = array<i64: 8, 256>}, {}, {}, {transform_indices = @transform_6, window_bounds = array<i64: 1, 8, 128>}, {transform_indices = @transform_7, window_bounds = array<i64: 1, 8, 64>}, {transform_indices = @transform_8, window_bounds = array<i64: 1, 8, 64>}]} {
    %c0 = arith.constant 0 : index
    %c0_0 = arith.constant 0 : index
    %c0_1 = arith.constant 0 : index
    %0 = vector.load %arg1[%c0, %c0_0, %c0_1] : memref<1x8x128xf32, #tpu.memory_space<vmem>>, vector<1x8x128xf32>
    %1 = vector.shape_cast %0 : vector<1x8x128xf32> to vector<8x128xf32>
    %2 = arith.truncf %1 : vector<8x128xf32> to vector<8x128xbf16>
    %c0_2 = arith.constant 0 : index
    %c0_3 = arith.constant 0 : index
    %3 = vector.load %arg2[%c0_2, %c0_3] : memref<128x256xbf16, #tpu.memory_space<vmem>>, vector<128x256xbf16>
    %cst = arith.constant dense<0.000000e+00> : vector<8x256xf32>
    %4 = tpu.matmul %2, %3, %cst {dimension_numbers = #tpu.dot_dimension_numbers<[1], [0], [0], [1], [0, 0, 1, 1], [], []>} : vector<8x128xbf16>, vector<128x256xbf16>, vector<8x256xf32> -> vector<8x256xf32>
    %5 = tpu.iota {dimensions = array<i32: 1>} : vector<8x256xi32>
    %c1_i32 = arith.constant 1 : i32
    %6 = vector.broadcast %c1_i32 : i32 to vector<8x256xi32>
    %7 = arith.andi %5, %6 : vector<8x256xi32>
    %c0_i32 = arith.constant 0 : i32
    %8 = vector.broadcast %c0_i32 : i32 to vector<8x256xi32>
    %9 = arith.cmpi eq, %7, %8 : vector<8x256xi32>
    %c255_i32 = arith.constant 255 : i32
    %10 = tpu.dynamic_rotate %4 by %c255_i32 dim 1 : vector<8x256xf32>, i32 -> vector<8x256xf32>
    %c1_i32_4 = arith.constant 1 : i32
    %11 = tpu.dynamic_rotate %4 by %c1_i32_4 dim 1 : vector<8x256xf32>, i32 -> vector<8x256xf32>
    %cst_5 = arith.constant 0.000000e+00 : f32
    %12 = vector.broadcast %cst_5 : f32 to vector<8x256xf32>
    %13 = arith.subf %12, %10 : vector<8x256xf32>
    %14 = arith.select %9, %13, %11 : vector<8x256xi1>, vector<8x256xf32>
    %c0_6 = arith.constant 0 : index
    %c0_7 = arith.constant 0 : index
    %15 = vector.load %arg3[%c0_6, %c0_7] : memref<8x256xf32, #tpu.memory_space<vmem>>, vector<8x256xf32>
    %16 = arith.mulf %4, %15 : vector<8x256xf32>
    %c0_8 = arith.constant 0 : index
    %c0_9 = arith.constant 0 : index
    %17 = vector.load %arg4[%c0_8, %c0_9] : memref<8x256xf32, #tpu.memory_space<vmem>>, vector<8x256xf32>
    %18 = arith.mulf %14, %17 : vector<8x256xf32>
    %19 = arith.addf %16, %18 : vector<8x256xf32>
    %20 = vector.extract_strided_slice %19 {offsets = [0, 0], sizes = [8, 128], strides = [1, 1]} : vector<8x256xf32> to vector<8x128xf32>
    %21 = arith.truncf %20 : vector<8x128xf32> to vector<8x128xbf16>
    %c0_10 = arith.constant 0 : index
    %c0_11 = arith.constant 0 : index
    %c0_12 = arith.constant 0 : index
    %22 = vector.load %arg7[%c0_10, %c0_11, %c0_12] : memref<1x8x128xbf16, #tpu.memory_space<vmem>>, vector<1x8x128xbf16>
    %23 = vector.shape_cast %22 : vector<1x8x128xbf16> to vector<8x128xbf16>
    %24 = vector.shape_cast %21 : vector<8x128xbf16> to vector<1x8x128xbf16>
    tpu.vector_store %arg7[%c0_10, %c0_11, %c0_12], %24 {strides = array<i32>} : memref<1x8x128xbf16, #tpu.memory_space<vmem>>, vector<1x8x128xbf16>,
    %25 = vector.extract_strided_slice %19 {offsets = [0, 128], sizes = [8, 64], strides = [1, 1]} : vector<8x256xf32> to vector<8x64xf32>
    %c0_13 = arith.constant 0 : index
    %c0_14 = arith.constant 0 : index
    %c0_15 = arith.constant 0 : index
    %26 = vector.load %arg8[%c0_13, %c0_14, %c0_15] : memref<1x8x64xf32, #tpu.memory_space<vmem>>, vector<1x8x64xf32>
    %27 = vector.shape_cast %26 : vector<1x8x64xf32> to vector<8x64xf32>
    %28 = vector.shape_cast %25 : vector<8x64xf32> to vector<1x8x64xf32>
    tpu.vector_store %arg8[%c0_13, %c0_14, %c0_15], %28 {strides = array<i32>} : memref<1x8x64xf32, #tpu.memory_space<vmem>>, vector<1x8x64xf32>,
    %29 = vector.extract_strided_slice %19 {offsets = [0, 192], sizes = [8, 64], strides = [1, 1]} : vector<8x256xf32> to vector<8x64xf32>
    %c0_16 = arith.constant 0 : index
    %c0_17 = arith.constant 0 : index
    %c0_18 = arith.constant 0 : index
    %30 = vector.load %arg9[%c0_16, %c0_17, %c0_18] : memref<1x8x64xf32, #tpu.memory_space<vmem>>, vector<1x8x64xf32>
    %31 = vector.shape_cast %30 : vector<1x8x64xf32> to vector<8x64xf32>
    %32 = vector.shape_cast %29 : vector<8x64xf32> to vector<1x8x64xf32>
    tpu.vector_store %arg9[%c0_16, %c0_17, %c0_18], %32 {strides = array<i32>} : memref<1x8x64xf32, #tpu.memory_space<vmem>>, vector<1x8x64xf32>,
    return
  }
  func.func @transform_0(%arg0: i32) -> (i32, i32, i32) {
    %c0_i32 = arith.constant 0 : i32
    %c0_i32_0 = arith.constant 0 : i32
    %c0_i32_1 = arith.constant 0 : i32
    return %arg0, %c0_i32, %c0_i32_0 : i32, i32, i32
  }
  func.func @transform_1(%arg0: i32) -> (i32, i32) {
    %c0_i32 = arith.constant 0 : i32
    %c0_i32_0 = arith.constant 0 : i32
    %c0_i32_1 = arith.constant 0 : i32
    return %c0_i32, %c0_i32_0 : i32, i32
  }
  func.func @transform_2(%arg0: i32) -> (i32, i32) {
    %c0_i32 = arith.constant 0 : i32
    %c0_i32_0 = arith.constant 0 : i32
    %c0_i32_1 = arith.constant 0 : i32
    return %c0_i32, %c0_i32_0 : i32, i32
  }
  func.func @transform_3(%arg0: i32) -> (i32, i32) {
    %c0_i32 = arith.constant 0 : i32
    %c0_i32_0 = arith.constant 0 : i32
    %c0_i32_1 = arith.constant 0 : i32
    return %c0_i32, %c0_i32_0 : i32, i32
  }
  func.func @transform_6(%arg0: i32) -> (i32, i32, i32) {
    %c0_i32 = arith.constant 0 : i32
    %c0_i32_0 = arith.constant 0 : i32
    %c0_i32_1 = arith.constant 0 : i32
    return %arg0, %c0_i32, %c0_i32_0 : i32, i32, i32
  }
  func.func @transform_7(%arg0: i32) -> (i32, i32, i32) {
    %c0_i32 = arith.constant 0 : i32
    %c0_i32_0 = arith.constant 0 : i32
    %c0_i32_1 = arith.constant 0 : i32
    return %arg0, %c0_i32, %c0_i32_0 : i32, i32, i32
  }
  func.func @transform_8(%arg0: i32) -> (i32, i32, i32) {
    %c0_i32 = arith.constant 0 : i32
    %c0_i32_0 = arith.constant 0 : i32
    %c0_i32_1 = arith.constant 0 : i32
    return %arg0, %c0_i32, %c0_i32_0 : i32, i32, i32
  }
}

</mosaic_0001>

<bundles_post_ra>
// kernel: tpu_custom_call.1
= control target key start
LH: loop header
LB: loop body
LE: loop exit
PB: predicated region body
PF: predicated region fallthrough
CT: control target
= control target key end

     0   :  { %s1159_s0 = inlined_call_operand.vmem [shape: f32[2,8,128], index: 0, kind: input, shape index: {}]   ;;  %s1160_s1 = inlined_call_operand.vmem [shape: bf16[128,256], index: 1, kind: input, shape index: {}]   ;;  %s1161_s2 = inlined_call_operand.vmem [shape: f32[8,256], index: 2, kind: input, shape index: {}]   ;;  %s1162_s3 = inlined_call_operand.vmem [shape: f32[8,256], index: 3, kind: input, shape index: {}]   ;;  %s1163_s4 = inlined_call_operand.hbm [shape: f32[4,16,64], index: 4, kind: input, shape index: {}, may-alias: {4,7}]   ;;  %s1164_s5 = inlined_call_operand.hbm [shape: f32[4,16,64], index: 5, kind: input, shape index: {}, may-alias: {5,8}]   ;;  %s1165_s6 = inlined_call_operand.hbm [shape: bf16[2,8,128], index: 6, kind: output, shape index: {0}]   ;;  %s1166_s7 = inlined_call_operand.hbm [shape: f32[4,16,64], index: 7, kind: output, shape index: {1}, may-alias: {4,7}]   ;;  %s1167_s8 = inlined_call_operand.hbm [shape: f32[4,16,64], index: 8, kind: output, shape index: {2}, may-alias: {5,8}]  }
   0x1   :  { %1171 = sst [smem:[#allocation9_spill]] %s1159_s0 }
   0x2   :  { %14 = vsyncpa [#allocation3], 0 }
   0x3   :  { %16 = vsyncpa [#allocation3 + $0x1], 0 }
   0x4   :  { %17 = vsyncpa [#allocation5], 0 }
   0x5   :  { %19 = vsyncpa [#allocation5 + $0x1], 0  ;;  %s912_s27 = smov 0   ;;  %s914_s28 = smov 0  }
   0x6   :  { %s916_s4 = smov 0   ;;  %s918_s5 = smov 0  }
   0x7 LB: > { %s933_s29 = sadd.s32 4294967295, %s858_s5   ;;  %s1168_s30 = sadd.s32 4294967294, %s858_s5   ;;  %s858_s5 = sphi %s918_s5, %s1181_s5   ;;  %s854_s4 = sphi %s916_s4, %s1180_s4   ;;  %s850_s28 = sphi %s914_s28, %s1179_s28   ;;  %s846_s27 = sphi %s912_s27, %s1178_s27  }
   0x8   : > { %s937_s9 = sadd.s32 1, %s858_s5   ;;  %s121_s10 = sadd.s32 1, %s854_s4 }
   0x9   : > { %s118_s11 = ssub.s32 %s858_s5, %s937_s9  ;;  %p131_p0 = scmp.ne.s32.totalorder %s854_s4, %s850_s28 }
   0xa   : > { %p119_p1 = scmp.eq.s32.totalorder %s118_s11, 0  ;;  %p132_p2 = scmp.eq.s32.totalorder %s933_s29, 1 }
   0xb   : > { %p137_p3 = scmp.ne.s32.totalorder %s850_s28, %s846_s27  ;;  %p138_p4 = scmp.eq.s32.totalorder %s1168_s30, 1 }
   0xc   : > { %s950_s12 = scalar_select %p119_p1, %s854_s4, %s121_s10  }
   0xd   : > { %p952_p5 = por %p132_p2, %p131_p0  ;;  %p956_p6 = por %p138_p4, %p137_p3 }
   0xe   : > { %p626_p7 = scmp.ge.s32.totalorder %s858_s5, 1  ;;  %p224_p8 = scmp.lt.s32.totalorder %s858_s5, 3 }
  0x10   : > { %p225_p9 = pnand %p626_p7, %p224_p8 }
  0x11   : > { %v712_v0 = vld [vmem:[%s1160_s1 + $0x4] ss:$8 sps:$4 sm:$0xff] (!%p225_p9)   ;;  %v714_v1 = vld [vmem:[%s1160_s1] ss:$8 sps:$4 sm:$0xff] (!%p225_p9)   ;;  %v860_v2 = vmov (!%p225_p9), 0   ;;  %p263_p10 = scmp.lt.s32.totalorder (!%p225_p9), %s933_s29, 1  ;;  %v407_v23 = vlaneseq (!%p225_p9) }
  0x12   : > { %228 = sbr.rel (%p225_p9) target bundleno = 518 (0x206), region = 36  ;;  %398 = vmatprep.mubr.bf16.mxu0 (!%p225_p9), %v860_v2  ;;  %366 = vmatprep.subr.bf16.mxu0 (!%p225_p9), %v712_v0  ;;  %v715_v3 = vld [vmem:[%s1160_s1 + $0x14] ss:$8 sps:$4 sm:$0xff] (!%p225_p9)   ;;  %v717_v4 = vld [vmem:[%s1160_s1 + $0x10] ss:$8 sps:$4 sm:$0xff] (!%p225_p9)   ;;  %s1174_s0 = sld [smem:[#allocation9_spill]] (!%p225_p9) }
  0x13   : > { %367 = vmatpush1.bf16.msra.mxu0 (!%p225_p9), %v714_v1  ;;  %v718_v5 = vld [vmem:[%s1160_s1 + $0x24] ss:$8 sps:$4 sm:$0xff] (!%p225_p9)   ;;  %v720_v6 = vld [vmem:[%s1160_s1 + $0x20] ss:$8 sps:$4 sm:$0xff] (!%p225_p9)   ;;  %v721_v7 = vld [vmem:[%s1160_s1 + $0x34] ss:$8 sps:$4 sm:$0xff] (!%p225_p9)  }
  0x14   : > { %368 = vmatprep.subr.bf16.mxu0 (!%p225_p9), %v715_v3  ;;  %v723_v8 = vld [vmem:[%s1160_s1 + $0x30] ss:$8 sps:$4 sm:$0xff] (!%p225_p9)   ;;  %v724_v9 = vld [vmem:[%s1160_s1 + $0x44] ss:$8 sps:$4 sm:$0xff] (!%p225_p9)   ;;  %v726_v10 = vld [vmem:[%s1160_s1 + $0x40] ss:$8 sps:$4 sm:$0xff] (!%p225_p9)  }
  0x15   : > { %v727_v11 = vld [vmem:[%s1160_s1 + $0x54] ss:$8 sps:$4 sm:$0xff] (!%p225_p9)   ;;  %v729_v12 = vld [vmem:[%s1160_s1 + $0x50] ss:$8 sps:$4 sm:$0xff] (!%p225_p9)   ;;  %v730_v13 = vld [vmem:[%s1160_s1 + $0x64] ss:$8 sps:$4 sm:$0xff] (!%p225_p9)  }
  0x16   : > { %v732_v14 = vld [vmem:[%s1160_s1 + $0x60] ss:$8 sps:$4 sm:$0xff] (!%p225_p9)   ;;  %v733_v15 = vld [vmem:[%s1160_s1 + $0x74] ss:$8 sps:$4 sm:$0xff] (!%p225_p9)   ;;  %v735_v16 = vld [vmem:[%s1160_s1 + $0x70] ss:$8 sps:$4 sm:$0xff] (!%p225_p9)  }
  0x17   : > { %369 = vmatpush1.bf16.msra.mxu0 (!%p225_p9), %v717_v4  ;;  %s862_s25 = smov (!%p225_p9), 127   ;;  %v408_v24 = vand.u32 (!%p225_p9), 127, %v407_v23  ;;  %s1016_s26 = sand.u32 (!%p225_p9), 1, %s850_s28   ;;  %v432_v32 = vld [vmem:[%s1161_s2] sm:$0xff] (!%p225_p9)  ;;  %v433_v33 = vld [vmem:[%s1161_s2 + $0x8] sm:$0xff] (!%p225_p9)  ;;  %vm444_vm4 = vcmask (!%p225_p9), 523264  }
  0x18   : > { %370 = vmatprep.subr.bf16.mxu0 (!%p225_p9), %v718_v5  ;;  %s1169_s10 = sshll.u32 (!%p225_p9), %s1016_s26, 3  ;;  %v436_v36 = vld [vmem:[%s1162_s3] sm:$0xff] (!%p225_p9)  ;;  %v437_v39 = vld [vmem:[%s1162_s3 + $0x8] sm:$0xff] (!%p225_p9)  ;;  %s456_s22 = sand.u32 (!%p225_p9), 1, %s933_s29  }
  0x19   : > { %s264_s23 = scalar_select %p263_p10, %s933_s29, 1  ;;  %v409_v25 = vadd.s32 128, %v408_v24  ;;  %v410_v28 = vand.u32 1, %v408_v24  ;;  %vm418_vm0 = vcmp.lt.s32.totalorder %v408_v24, 127  ;;  %vm425_vm1 = vcmp.lt.s32.totalorder %v408_v24, 1 }
  0x1a   : > { %s627_s24 = sshll.u32 %s1016_s26, 2  ;;  %s650_s15 = sshll.u32 %s933_s29, 6 }
  0x1b   : > { %371 = vmatpush1.bf16.msra.mxu0 %v720_v6  ;;  %s630_s11 = sshll.u32 %s264_s23, 3  ;;  %s861_s23 = smov 1   ;;  %v411_v29 = vand.u32 1, %v409_v25  ;;  %vm412_vm2 = vcmp.eq.s32.totalorder %v410_v28, 0 }
  0x1c   : > { %372 = vmatprep.subr.bf16.mxu0 %v721_v7  ;;  %s266_s21 = scalar_lea.vmem %s1174_s0, %s630_s11  ;;  %s1039_s16 = scalar_lea.vmem [#allocation2], %s627_s24 }
  0x1d   : > { %v268_v17 = vld [vmem:[%s266_s21] sm:$0xff]  ;;  %vm413_vm3 = vcmp.eq.s32.totalorder %v411_v29, 0  ;;  %s475_s17 = sshll.u32 %s1039_s16, 4  ;;  %s863_s21 = smov 64   ;;  %s1057_s17 = int_to_ptr.vmem [resolvable:$true] %s475_s17 }
  0x1e   : > { %v269_v18 = vpack.c.bf16 %v268_v17, %v268_v17  ;;  %s1059_s18 = scalar_lea.sflag [#allocation5], %s456_s22 }
  0x1f   : > { %373 = vmatpush1.bf16.msra.mxu0 %v723_v8 }
  0x20   : > { %374 = vmatprep.subr.bf16.mxu0 %v724_v9 }
  0x23   : > { %375 = vmatpush1.bf16.msra.mxu0 %v726_v10 }
  0x24   : > { %376 = vmatprep.subr.bf16.mxu0 %v727_v11 }
  0x27   : > { %377 = vmatpush1.bf16.msra.mxu0 %v729_v12 }
  0x28   : > { %378 = vmatprep.subr.bf16.mxu0 %v730_v13 }
  0x2b   : > { %379 = vmatpush1.bf16.msra.mxu0 %v732_v14 }
  0x2c   : > { %380 = vmatprep.subr.bf16.mxu0 %v733_v15 }
  0x2f   : > { %381 = vmatpush1.bf16.msra.mxu0 %v735_v16 }
  0x32   : > { %399 = vmatmul.mubr.bf16.vlgmr.msra.gmra.mrb[0].mxu0 %v269_v18 }
 0x105   : > { %v400_v19 = vpop.f32.mrb[0].mxu0 }
 0x106   : > { %421 = vrot.lane.b32.xlu1 %v400_v19, %s861_s23  ;;  %414 = vrot.lane.b32.xlu0 %v400_v19, %s862_s25  ;;  %v402_v20 = vpop.f32.mrb[1].mxu0  ;;  %v434_v44 = vmul.f32 %v432_v32, %v400_v19 }
 0x107   : > { %v404_v21 = vpop.f32.mrb[2].mxu0  ;;  %v435_v45 = vmul.f32 %v433_v33, %v402_v20 }
 0x108   : > { %v405_v22 = vpop.f32.mrb[3].mxu0 }
 0x10a   : > { %423 = vrot.lane.b32.xlu1 %v402_v20, %s861_s23  ;;  %416 = vrot.lane.b32.xlu0 %v402_v20, %s862_s25  ;;  %s1170_s23 = sshll.u32 %s933_s29, 8  ;;  %s255_s25 = scalar_lea.vmem [#allocation4], %s1169_s10 }
 0x10b   : > { %s489_s11 = sshll.u32 %s255_s25, 4  ;;  %s1047_s20 = scalar_lea.hbm %s1166_s7, %s1170_s23  ;;  %s1049_s11 = int_to_ptr.vmem [resolvable:$true] %s489_s11 }
 0x10c   : > { %s1055_s10 = scalar_lea.hbm %s1165_s6, %s650_s15  ;;  %s736_s19 = scalar_lea.vmem %s1049_s11, 128 }
 0x10d   : > { %p737_p11 = scmp.ne.s32.totalorder %s1049_s11, %s736_s19  ;;  %s864_s23 = smov [#allocation4]  }
 0x10e   : > { %s740_s0 = sshll.u32 %s864_s23, 4  ;;  %s741_s0 = int_to_ptr.vmem [resolvable:$false] %s740_s0 }
 0x10f   : > { %p738_p12 = pnand %p737_p11, %p952_p5  ;;  %p743_p0 = scmp.lt.s32.totalorder %s1049_s11, %s741_s0 }
 0x111   : > { %p739_p13 = pneg %p738_p12 }
 0x178   : > { %v422_v26 = vpop.permute.xlu1 %421  ;;  %v415_v27 = vpop.permute.xlu0 %414 }
 0x17c   : > { %v424_v30 = vpop.permute.xlu1 %423  ;;  %v417_v31 = vpop.permute.xlu0 %416 }
 0x17d   : > { %v419_v34 = vsel %vm418_vm0, %v415_v27, %v417_v31  ;;  %v420_v35 = vsel %vm418_vm0, %v417_v31, %v415_v27  ;;  %v426_v40 = vsel %vm425_vm1, %v422_v26, %v424_v30  ;;  %v427_v41 = vsel %vm425_vm1, %v424_v30, %v422_v26 }
 0x17e   : > { %v428_v37 = vsub.f32 0.0, %v419_v34  ;;  %v429_v38 = vsub.f32 0.0, %v420_v35 }
 0x180   : > { %v430_v42 = vsel %vm412_vm2, %v428_v37, %v427_v41  ;;  %v431_v43 = vsel %vm413_vm3, %v429_v38, %v426_v40 }
 0x181   : > { %v438_v46 = vmul.f32 %v436_v36, %v430_v42  ;;  %v439_v47 = vmul.f32 %v437_v39, %v431_v43 }
 0x183   : > { %v441_v48 = vadd.f32 %v439_v47, %v435_v45  ;;  %v440_v49 = vadd.f32 %v438_v46, %v434_v44 }
 0x185   : > { %447 = vrot.lane.b32.xlu0 %v441_v48, %s863_s21  ;;  %445 = vst.msk [vmem:[%s255_s25] sm:$0xff] %vm444_vm4, %v441_v48  ;;  %v442_v50 = vpack.c.bf16 %v440_v49, %v440_v49  ;;  %s742_s21 = scalar_lea.vmem %s741_s0, 256 }
 0x186   : > { %p744_p1 = scmp.lt.s32.totalorder %s742_s21, %s736_s19 }
 0x188   : > { %p745_p2 = por %p744_p1, %p743_p0 }
 0x18a   : > { %p746_p3 = pnand %p745_p2, %p739_p13 }
 0x18c   : > { %749 = shalt.err (!%p746_p3)
}
 0x18d   : > { %s750_s30 = scalar_lea.hbm %s1047_s20, 128  ;;  %s754_s23 = scalar_lea.hbm %s1166_s7, 1024 }
 0x18e   : > { %p751_p4 = scmp.ne.s32.totalorder %s1047_s20, %s750_s30  ;;  %p755_p9 = scmp.lt.u32.totalorder %s1047_s20, %s1166_s7 }
 0x18f   : > { %p756_p10 = scmp.lt.u32.totalorder %s754_s23, %s750_s30  ;;  %p758_p12 = scmp.lt.u32.totalorder %s750_s30, %s1047_s20 }
 0x190   : > { %p752_p7 = pnand %p751_p4, %p952_p5 }
 0x191   : > { %p757_p11 = por %p756_p10, %p755_p9 }
 0x192   : > { %p753_p8 = pneg %p752_p7 }
 0x193   : > { %p759_p13 = por %p758_p12, %p757_p11 }
 0x195   : > { %p760_p0 = pnand %p759_p13, %p753_p8 }
 0x197   : > { %763 = shalt.err (!%p760_p0)
}
 0x198   : > { %660 = dma.vmem_to_hbm [thread:$0]  (%p952_p5), %s1049_s11, 128, %s1047_s20, %s1059_s18   ;;  %443 = vst [vmem:[%s1039_s16] sm:$0xf] %v442_v50 }
 0x199   : > { %s452_s24 = scalar_lea.sflag [#allocation3], %s1016_s26  ;;  %s764_s19 = scalar_lea.vmem %s1057_s17, 64 }
 0x19a   : > { %p765_p1 = scmp.ne.s32.totalorder %s1057_s17, %s764_s19  ;;  %s865_s21 = smov [#allocation2]  }
 0x19b   : > { %s768_s30 = sshll.u32 %s865_s21, 4  ;;  %s769_s30 = int_to_ptr.vmem [resolvable:$false] %s768_s30 }
 0x19c   : > { %p766_p2 = pnand %p765_p1, %p952_p5  ;;  %s770_s22 = scalar_lea.vmem %s769_s30, 128 }
 0x19d   : > { %p771_p4 = scmp.lt.s32.totalorder %s1057_s17, %s769_s30  ;;  %p772_p7 = scmp.lt.s32.totalorder %s770_s22, %s764_s19 }
 0x19e   : > { %p767_p3 = pneg %p766_p2 }
 0x19f   : > { %p773_p8 = por %p772_p7, %p771_p4 }
 0x1a1   : > { %p774_p9 = pnand %p773_p8, %p767_p3 }
 0x1a3   : > { %777 = shalt.err (!%p774_p9)
}
 0x1a4   : > { %s778_s11 = scalar_lea.hbm %s1055_s10, 64  ;;  %s782_s25 = scalar_lea.hbm %s1165_s6, 128 }
 0x1a5   : > { %p779_p10 = scmp.ne.s32.totalorder %s1055_s10, %s778_s11  ;;  %p783_p13 = scmp.lt.u32.totalorder %s1055_s10, %s1165_s6 }
 0x1a6   : > { %p784_p0 = scmp.lt.u32.totalorder %s782_s25, %s778_s11  ;;  %p786_p2 = scmp.lt.u32.totalorder %s778_s11, %s1055_s10 }
 0x1a7   : > { %p780_p11 = pnand %p779_p10, %p952_p5 }
 0x1a8   : > { %p785_p1 = por %p784_p0, %p783_p13 }
 0x1a9   : > { %p781_p12 = pneg %p780_p11 }
 0x1aa   : > { %p787_p3 = por %p786_p2, %p785_p1 }
 0x1ac   : > { %p788_p4 = pnand %p787_p3, %p781_p12 }
 0x1ae   : > { %791 = shalt.err (!%p788_p4)
}
 0x1af   : > { %659 = dma.vmem_to_hbm [thread:$0]  (%p952_p5), %s1057_s17, 64, %s1055_s10, %s452_s24  }
 0x1b0   : > { %s1175_s0 = sshll.u32 %s1016_s26, 3  ;;  %s1176_s30 = sshll.u32 %s933_s29, 8 }
 0x1b1   : > { %s262_s19 = scalar_lea.vmem [#allocation6], %s1175_s0  ;;  %s1115_s11 = scalar_lea.hbm %s1167_s8, %s1176_s30 }
 0x1b2   : > { %s503_s21 = sshll.u32 %s262_s19, 4  ;;  %s866_s26 = smov [#allocation6]   ;;  %s1108_s21 = int_to_ptr.vmem [resolvable:$true] %s503_s21 }
 0x1b3   : > { %s792_s20 = scalar_lea.vmem %s1108_s21, 128  ;;  %s796_s10 = sshll.u32 %s866_s26, 4  ;;  %s797_s10 = int_to_ptr.vmem [resolvable:$false] %s796_s10 }
 0x1b4   : > { %p793_p7 = scmp.ne.s32.totalorder %s1108_s21, %s792_s20  ;;  %s798_s29 = scalar_lea.vmem %s797_s10, 256 }
 0x1b5   : > { %p799_p10 = scmp.lt.s32.totalorder %s1108_s21, %s797_s10  ;;  %p800_p11 = scmp.lt.s32.totalorder %s798_s29, %s792_s20 }
 0x1b6   : > { %p794_p8 = pnand %p793_p7, %p952_p5 }
 0x1b7   : > { %p801_p12 = por %p800_p11, %p799_p10 }
 0x1b8   : > { %p795_p9 = pneg %p794_p8 }
 0x1ba   : > { %p802_p13 = pnand %p801_p12, %p795_p9 }
 0x1f7   : > { %v448_v51 = vpop.permute.xlu0 %447 }
 0x1f8   : > { %450 = vst.msk [vmem:[%s262_s19] sm:$0xff] %vm444_vm4, %v448_v51 }
 0x1f9   : > { %805 = shalt.err (!%p802_p13)
}
 0x1fa   : > { %s806_s17 = scalar_lea.hbm %s1115_s11, 128  ;;  %s810_s23 = scalar_lea.hbm %s1167_s8, 1024 }
 0x1fb   : > { %p807_p0 = scmp.ne.s32.totalorder %s1115_s11, %s806_s17  ;;  %p811_p3 = scmp.lt.u32.totalorder %s1115_s11, %s1167_s8 }
 0x1fc   : > { %p812_p4 = scmp.lt.u32.totalorder %s810_s23, %s806_s17  ;;  %p814_p8 = scmp.lt.u32.totalorder %s806_s17, %s1115_s11 }
 0x1fd   : > { %p808_p1 = pnand %p807_p0, %p952_p5 }
 0x1fe   : > { %p813_p7 = por %p812_p4, %p811_p3 }
 0x1ff   : > { %p809_p2 = pneg %p808_p1 }
 0x200   : > { %p815_p9 = por %p814_p8, %p813_p7 }
 0x202   : > { %p816_p10 = pnand %p815_p9, %p809_p2 }
 0x204   : > { %819 = shalt.err (!%p816_p10)
}
 0x205   : > { %661 = dma.vmem_to_hbm [thread:$0]  (%p952_p5), %s1108_s21, 128, %s1115_s11, %s1059_s18  }
 0x206 PF: > { %p675_p11 = scmp.ge.s32.totalorder %s858_s5, 2  ;;  %s515_s19 = sand.u32 1, %s846_s27  }
 0x207   : > { %s516_s30 = scalar_lea.sflag [#allocation3], %s515_s19 }
 0x208   : > { %p666_p12 = pnand %p675_p11, %p956_p6 }
 0x20a   : > { %837 = dma.done.wait (!%p666_p12), %s516_s30, 64  }
 0x20b   : > { %839 = vsyncadd (!%p666_p12), %s516_s30, 4294967232  ;;  %s1177_s22 = sadd.s32 4294967294, %s858_s5  }
 0x20c   : > { %s524_s16 = sand.u32 1, %s1177_s22  }
 0x20d   : > { %s525_s20 = scalar_lea.sflag [#allocation5], %s524_s16 }
 0x20e   : > { %841 = dma.done.wait (!%p666_p12), %s525_s20, 256  }
 0x20f   : > { %843 = vsyncadd (!%p666_p12), %s525_s20, 4294967040  ;;  %p22_p5 = scmp.ge.s32.totalorder %s937_s9, 4   ;;  %s1178_s27 = smov %s850_s28 }
 0x210   : > { %s1179_s28 = smov %s854_s4  ;;  %s1180_s4 = smov %s950_s12 }
 0x211   : > { %s1181_s5 = smov %s937_s9  ;;  %24 = sbr.rel (!%p22_p5) target bundleno = 7 (0x7), region = 103 }
 0x218   :  { %539 = vsyncpa [#allocation3], 1 }
 0x219   :  { %541 = vsyncpa [#allocation3 + $0x1], 1 }
 0x21a   :  { %542 = vsyncpa [#allocation5], 1 }
 0x21b   :  { %544 = vsyncpa [#allocation5 + $0x1], 1 }

</bundles_post_ra>
